<compile_context>
chip_gen: v7x
topology: tpu7x:2x2x1
jax: 0.10.0
libtpu: 0.0.40
codegen_flags: <defaults>
</compile_context>

<pallas_src>
import functools

import jax
import jax.numpy as jnp
from jax.experimental import pallas as pl
from jax.experimental.pallas import tpu as pltpu

HIDDEN = 64
LANE = 128


def _round_up(x, m):
    return ((x + m - 1) // m) * m


def _pad2(a, shape):
    return jnp.pad(a, ((0, shape[0] - a.shape[0]), (0, shape[1] - a.shape[1])))


def _policy_kernel(x_ref, w1_ref, b1_ref, w2_ref, b2_ref, w3_ref, b3_ref, mean_ref):
    # x_ref:    [TILE_B, S]  f32 (cast to compute dtype in-kernel; free on the VPU)
    # w*_ref:   padded weights in compute dtype; b*_ref: biases in f32
    # mean_ref: [TILE_B, A]  f32, narrow (no lane padding -> no write amplification)
    x = x_ref[...].astype(w1_ref.dtype)
    h1 = jnp.dot(x, w1_ref[...], preferred_element_type=jnp.float32)        # [T, H_PAD] f32
    h1 = jnp.maximum(h1 + b1_ref[...], 0.0)                                 # f32 VPU math
    h2 = jnp.dot(h1.astype(w2_ref.dtype), w2_ref[...],
                 preferred_element_type=jnp.float32)                        # [T, H_PAD] f32
    h2 = jnp.maximum(h2 + b2_ref[...], 0.0)
    mean = jnp.dot(h2.astype(w3_ref.dtype), w3_ref[...],
                   preferred_element_type=jnp.float32)                      # [T, A] f32
    mean_ref[...] = (mean + b3_ref[...]).astype(mean_ref.dtype)


def prepare_params(params, *, compute_dtype=jnp.bfloat16):
    """Pad/cast parameters once (per policy update), not once per forward call.

    Weights are padded on the hidden (contraction) dim to 128 lanes for the MXU;
    the action dim of w3/b3 is left narrow so the kernel output stays narrow.
    """
    w1, b1, w2, b2, w3, b3, log_std = params
    S, H = w1.shape
    A = w3.shape[1]
    H_PAD = _round_up(H, LANE)
    cd = compute_dtype

    w1p = _pad2(w1, (S, H_PAD)).astype(cd)
    w2p = _pad2(w2, (H_PAD, H_PAD)).astype(cd)
    w3p = _pad2(w3, (H_PAD, A)).astype(cd)
    b1p = _pad2(b1.reshape(1, -1), (1, H_PAD)).astype(jnp.float32)
    b2p = _pad2(b2.reshape(1, -1), (1, H_PAD)).astype(jnp.float32)
    b3p = b3.reshape(1, -1).astype(jnp.float32)
    # std = exp(log_std): batch-independent, computed once here.
    std = jnp.exp(log_std.reshape(-1).astype(jnp.float32))
    return (w1p, b1p, w2p, b2p, w3p, b3p, std)


def policy_forward(state, prepared, *, tile_b=2048):
    """state: [B, state_dim] f32; prepared: output of prepare_params.

    Returns (mean [B, action_dim] f32, std [action_dim] f32)."""
    w1p, b1p, w2p, b2p, w3p, b3p, std = prepared
    B, S = state.shape
    H_PAD = w1p.shape[1]
    A = w3p.shape[1]

    # Adaptive batch tile: largest tile <= tile_b that (nearly) evenly covers B,
    # rounded to 8 sublanes; force >=2 grid steps when B allows so v7x's two
    # TensorCores both get work under dimension_semantics=("parallel",).
    n_tiles = pl.cdiv(B, tile_b)
    if n_tiles < 2 and B >= 16:
        n_tiles = 2
    TILE_B = max(8, _round_up(pl.cdiv(B, n_tiles), 8))
    grid = (pl.cdiv(B, TILE_B),)

    itemsize = jnp.dtype(w1p.dtype).itemsize
    flops = 2 * B * (S * H_PAD + H_PAD * H_PAD + H_PAD * A)
    bytes_accessed = (
        B * S * 4                                                # state in (f32)
        + (S * H_PAD + H_PAD * H_PAD + H_PAD * A) * itemsize     # weights
        + (2 * H_PAD + A) * 4                                    # biases
        + B * A * 4                                              # mean out (narrow, f32)
    )

    mean = pl.pallas_call(
        _policy_kernel,
        out_shape=jax.ShapeDtypeStruct((B, A), jnp.float32),
        grid=grid,
        in_specs=[
            pl.BlockSpec((TILE_B, S), lambda i: (i, 0)),          # state tile (pipelined)
            pl.BlockSpec((S, H_PAD), lambda i: (0, 0)),           # w1 (VMEM-resident)
            pl.BlockSpec((1, H_PAD), lambda i: (0, 0)),           # b1
            pl.BlockSpec((H_PAD, H_PAD), lambda i: (0, 0)),       # w2
            pl.BlockSpec((1, H_PAD), lambda i: (0, 0)),           # b2
            pl.BlockSpec((H_PAD, A), lambda i: (0, 0)),           # w3 (narrow out dim)
            pl.BlockSpec((1, A), lambda i: (0, 0)),               # b3
        ],
        out_specs=pl.BlockSpec((TILE_B, A), lambda i: (i, 0)),
        compiler_params=pltpu.CompilerParams(
            dimension_semantics=("parallel",)),
        cost_estimate=pl.CostEstimate(
            flops=flops, transcendentals=0, bytes_accessed=bytes_accessed),
    )(state.astype(jnp.float32), w1p, b1p, w2p, b2p, w3p, b3p)

    return mean, std


def init_params(key, state_dim, action_dim):
    """Deterministic synthetic init mimicking PyTorch Linear shapes
    (weights stored transposed: [in_dim, out_dim])."""
    k1, k2, k3, k4, k5, k6 = jax.random.split(key, 6)

    def unif(k, shape, fan_in):
        bound = 1.0 / jnp.sqrt(float(fan_in))
        return jax.random.uniform(k, shape, jnp.float32, -bound, bound)

    w1 = unif(k1, (state_dim, HIDDEN), state_dim)
    b1 = unif(k2, (1, HIDDEN), state_dim)
    w2 = unif(k3, (HIDDEN, HIDDEN), HIDDEN)
    b2 = unif(k4, (1, HIDDEN), HIDDEN)
    w3 = unif(k5, (HIDDEN, action_dim), HIDDEN)
    b3 = unif(k6, (1, action_dim), HIDDEN)
    log_std = jnp.zeros((1, action_dim), jnp.float32)   # nn.Parameter(torch.zeros)
    return (w1, b1, w2, b2, w3, b3, log_std)


def reference_forward(state, params):
    w1, b1, w2, b2, w3, b3, log_std = params
    h = jnp.maximum(state @ w1 + b1, 0.0)
    h = jnp.maximum(h @ w2 + b2, 0.0)
    mean = h @ w3 + b3
    std = jnp.exp(log_std).reshape(-1)
    return mean, std


if __name__ == "__main__":
    key = jax.random.PRNGKey(0)
    kx, kp = jax.random.split(key)

    batch, state_dim, action_dim = 8, 8, 4
    state = jax.random.normal(kx, (batch, state_dim), jnp.float32)
    params = init_params(kp, state_dim, action_dim)

    ref_mean, ref_std = reference_forward(state, params)

    fwd = jax.jit(functools.partial(policy_forward))

    # Strict correctness check with f32 compute.
    prep32 = prepare_params(params, compute_dtype=jnp.float32)
    mean32, std32 = fwd(state, prep32)
    jax.block_until_ready((mean32, std32))
    assert mean32.shape == (batch, action_dim)
    assert std32.shape == (action_dim,)
    assert jnp.allclose(mean32, ref_mean, atol=1e-5, rtol=1e-5)
    assert jnp.allclose(std32, ref_std, atol=1e-6, rtol=1e-6)

    # Default bf16 performance path (f32 accumulation) with loose tolerance.
    prep_bf = prepare_params(params)
    mean_bf, std_bf = fwd(state, prep_bf)
    jax.block_until_ready((mean_bf, std_bf))
    assert mean_bf.shape == (batch, action_dim)
    assert std_bf.shape == (action_dim,)
    assert jnp.allclose(mean_bf, ref_mean, atol=5e-2, rtol=5e-2)
    assert jnp.allclose(std_bf, ref_std, atol=1e-6, rtol=1e-6)

    print("KERNEL_OK")
</pallas_src>

<mosaic_0001>
module attributes {stable_mosaic.version = 11 : i64} {
  func.func @_policy_kernel(%arg0: i32, %arg1: memref<8x8xf32, #tpu.memory_space<vmem>>, %arg2: memref<8x128xf32, #tpu.memory_space<vmem>>, %arg3: memref<1x128xf32, #tpu.memory_space<vmem>>, %arg4: memref<128x128xf32, #tpu.memory_space<vmem>>, %arg5: memref<1x128xf32, #tpu.memory_space<vmem>>, %arg6: memref<128x4xf32, #tpu.memory_space<vmem>>, %arg7: memref<1x4xf32, #tpu.memory_space<vmem>>, %arg8: memref<8x4xf32, #tpu.memory_space<vmem>>) attributes {dimension_semantics = [#tpu.dimension_semantics<parallel>], iteration_bounds = array<i64: 1>, scalar_prefetch = 0 : i64, scratch_operands = 0 : i64, tpu.core_type = #tpu.core_type<tc>, window_params = [{transform_indices = @transform_0, window_bounds = array<i64: 8, 8>}, {pipeline_mode = #tpu.pipeline_mode<synchronous>, transform_indices = @transform_1, window_bounds = array<i64: 8, 128>}, {pipeline_mode = #tpu.pipeline_mode<synchronous>, transform_indices = @transform_2, window_bounds = array<i64: 1, 128>}, {pipeline_mode = #tpu.pipeline_mode<synchronous>, transform_indices = @transform_3, window_bounds = array<i64: 128, 128>}, {pipeline_mode = #tpu.pipeline_mode<synchronous>, transform_indices = @transform_4, window_bounds = array<i64: 1, 128>}, {pipeline_mode = #tpu.pipeline_mode<synchronous>, transform_indices = @transform_5, window_bounds = array<i64: 128, 4>}, {pipeline_mode = #tpu.pipeline_mode<synchronous>, transform_indices = @transform_6, window_bounds = array<i64: 1, 4>}, {transform_indices = @transform_7, window_bounds = array<i64: 8, 4>}]} {
    %c0 = arith.constant 0 : index
    %c0_0 = arith.constant 0 : index
    %0 = vector.load %arg1[%c0, %c0_0] : memref<8x8xf32, #tpu.memory_space<vmem>>, vector<8x8xf32>
    %c0_1 = arith.constant 0 : index
    %c0_2 = arith.constant 0 : index
    %1 = vector.load %arg2[%c0_1, %c0_2] : memref<8x128xf32, #tpu.memory_space<vmem>>, vector<8x128xf32>
    %cst = arith.constant dense<0.000000e+00> : vector<8x128xf32>
    %2 = tpu.matmul %0, %1, %cst {dimension_numbers = #tpu.dot_dimension_numbers<[1], [0], [0], [1], [0, 0, 1, 1], [], []>} : vector<8x8xf32>, vector<8x128xf32>, vector<8x128xf32> -> vector<8x128xf32>
    %c0_3 = arith.constant 0 : index
    %c0_4 = arith.constant 0 : index
    %3 = vector.load %arg3[%c0_3, %c0_4] : memref<1x128xf32, #tpu.memory_space<vmem>>, vector<1x128xf32>
    %4 = vector.broadcast %3 : vector<1x128xf32> to vector<8x128xf32>
    %5 = arith.addf %2, %4 : vector<8x128xf32>
    %cst_5 = arith.constant 0.000000e+00 : f32
    %6 = vector.broadcast %cst_5 : f32 to vector<8x128xf32>
    %7 = arith.maximumf %5, %6 : vector<8x128xf32>
    %c0_6 = arith.constant 0 : index
    %c0_7 = arith.constant 0 : index
    %8 = vector.load %arg4[%c0_6, %c0_7] : memref<128x128xf32, #tpu.memory_space<vmem>>, vector<128x128xf32>
    %cst_8 = arith.constant dense<0.000000e+00> : vector<8x128xf32>
    %9 = tpu.matmul %7, %8, %cst_8 {dimension_numbers = #tpu.dot_dimension_numbers<[1], [0], [0], [1], [0, 0, 1, 1], [], []>} : vector<8x128xf32>, vector<128x128xf32>, vector<8x128xf32> -> vector<8x128xf32>
    %c0_9 = arith.constant 0 : index
    %c0_10 = arith.constant 0 : index
    %10 = vector.load %arg5[%c0_9, %c0_10] : memref<1x128xf32, #tpu.memory_space<vmem>>, vector<1x128xf32>
    %11 = vector.broadcast %10 : vector<1x128xf32> to vector<8x128xf32>
    %12 = arith.addf %9, %11 : vector<8x128xf32>
    %cst_11 = arith.constant 0.000000e+00 : f32
    %13 = vector.broadcast %cst_11 : f32 to vector<8x128xf32>
    %14 = arith.maximumf %12, %13 : vector<8x128xf32>
    %c0_12 = arith.constant 0 : index
    %c0_13 = arith.constant 0 : index
    %15 = vector.load %arg6[%c0_12, %c0_13] : memref<128x4xf32, #tpu.memory_space<vmem>>, vector<128x4xf32>
    %cst_14 = arith.constant dense<0.000000e+00> : vector<8x4xf32>
    %16 = tpu.matmul %14, %15, %cst_14 {dimension_numbers = #tpu.dot_dimension_numbers<[1], [0], [0], [1], [0, 0, 1, 1], [], []>} : vector<8x128xf32>, vector<128x4xf32>, vector<8x4xf32> -> vector<8x4xf32>
    %c0_15 = arith.constant 0 : index
    %c0_16 = arith.constant 0 : index
    %17 = vector.load %arg7[%c0_15, %c0_16] : memref<1x4xf32, #tpu.memory_space<vmem>>, vector<1x4xf32>
    %18 = vector.broadcast %17 : vector<1x4xf32> to vector<8x4xf32>
    %19 = arith.addf %16, %18 : vector<8x4xf32>
    %c0_17 = arith.constant 0 : index
    %c0_18 = arith.constant 0 : index
    %20 = vector.load %arg8[%c0_17, %c0_18] : memref<8x4xf32, #tpu.memory_space<vmem>>, vector<8x4xf32>
    tpu.vector_store %arg8[%c0_17, %c0_18], %19 {strides = array<i32>} : memref<8x4xf32, #tpu.memory_space<vmem>>, vector<8x4xf32>,
    return
  }
  func.func @transform_0(%arg0: i32) -> (i32, i32) {
    %c0_i32 = arith.constant 0 : i32
    %c0_i32_0 = arith.constant 0 : i32
    return %arg0, %c0_i32 : i32, i32
  }
  func.func @transform_1(%arg0: i32) -> (i32, i32) {
    %c0_i32 = arith.constant 0 : i32
    %c0_i32_0 = arith.constant 0 : i32
    %c0_i32_1 = arith.constant 0 : i32
    return %c0_i32, %c0_i32_0 : i32, i32
  }
  func.func @transform_2(%arg0: i32) -> (i32, i32) {
    %c0_i32 = arith.constant 0 : i32
    %c0_i32_0 = arith.constant 0 : i32
    %c0_i32_1 = arith.constant 0 : i32
    return %c0_i32, %c0_i32_0 : i32, i32
  }
  func.func @transform_3(%arg0: i32) -> (i32, i32) {
    %c0_i32 = arith.constant 0 : i32
    %c0_i32_0 = arith.constant 0 : i32
    %c0_i32_1 = arith.constant 0 : i32
    return %c0_i32, %c0_i32_0 : i32, i32
  }
  func.func @transform_4(%arg0: i32) -> (i32, i32) {
    %c0_i32 = arith.constant 0 : i32
    %c0_i32_0 = arith.constant 0 : i32
    %c0_i32_1 = arith.constant 0 : i32
    return %c0_i32, %c0_i32_0 : i32, i32
  }
  func.func @transform_5(%arg0: i32) -> (i32, i32) {
    %c0_i32 = arith.constant 0 : i32
    %c0_i32_0 = arith.constant 0 : i32
    %c0_i32_1 = arith.constant 0 : i32
    return %c0_i32, %c0_i32_0 : i32, i32
  }
  func.func @transform_6(%arg0: i32) -> (i32, i32) {
    %c0_i32 = arith.constant 0 : i32
    %c0_i32_0 = arith.constant 0 : i32
    %c0_i32_1 = arith.constant 0 : i32
    return %c0_i32, %c0_i32_0 : i32, i32
  }
  func.func @transform_7(%arg0: i32) -> (i32, i32) {
    %c0_i32 = arith.constant 0 : i32
    %c0_i32_0 = arith.constant 0 : i32
    return %arg0, %c0_i32 : i32, i32
  }
}

</mosaic_0001>

<bundles_post_ra>
// kernel: policy_forward.1
= control target key start
LH: loop header
LB: loop body
LE: loop exit
PB: predicated region body
PF: predicated region fallthrough
CT: control target
= control target key end

     0   :  { %12 = vsyncpa [#allocation3], 0  ;;  %s507_s24 = smov [#allocation2]   ;;  %s693_s0 = inlined_call_operand.vmem [shape: f32[8,8], index: 0, kind: input, shape index: {}]   ;;  %s694_s1 = inlined_call_operand.vmem [shape: f32[8,128], index: 1, kind: input, shape index: {}]   ;;  %s695_s2 = inlined_call_operand.vmem [shape: f32[1,128], index: 2, kind: input, shape index: {}]   ;;  %s696_s3 = inlined_call_operand.vmem [shape: f32[128,128], index: 3, kind: input, shape index: {}]   ;;  %s697_s4 = inlined_call_operand.vmem [shape: f32[1,128], index: 4, kind: input, shape index: {}]   ;;  %s698_s5 = inlined_call_operand.vmem [shape: f32[128,4], index: 5, kind: input, shape index: {}]   ;;  %s699_s6 = inlined_call_operand.hbm [shape: f32[1,4], index: 6, kind: input, shape index: {}]   ;;  %s700_s7 = inlined_call_operand.vmem [shape: f32[8,4], index: 7, kind: output, shape index: {}]  }
   0x1   :  { %s31_s25 = sshll.u32 %s507_s24, 4  ;;  %s483_s28 = scalar_lea.hbm %s699_s6, 16  ;;  %s32_s25 = int_to_ptr.vmem [resolvable:$true] %s31_s25 }
   0x2   :  { %p484_p0 = scmp.ne.s32.totalorder %s699_s6, %s483_s28  ;;  %p487_p1 = scmp.lt.u32.totalorder %s483_s28, %s699_s6 }
   0x4   :  { %p489_p2 = pnand %p487_p1, %p484_p0 }
   0x6   :  { %492 = shalt.err (!%p489_p2)
}
   0x7   :  { %s493_s10 = scalar_lea.vmem %s32_s25, 16  ;;  %s497_s11 = scalar_lea.vmem %s32_s25, 32 }
   0x8   :  { %p494_p3 = scmp.ne.s32.totalorder %s32_s25, %s493_s10  ;;  %p498_p4 = scmp.lt.s32.totalorder %s32_s25, %s32_s25 }
   0x9   :  { %p499_p5 = scmp.lt.s32.totalorder %s497_s11, %s493_s10 }
   0xb   :  { %p500_p6 = por %p499_p5, %p498_p4 }
   0xd   :  { %p501_p7 = pnand %p500_p6, %p494_p3 }
   0xf   :  { %504 = shalt.err (!%p501_p7)
}
  0x10   :  { %34 = dma.hbm_to_vmem [thread:$0]  %s699_s6, 16, %s32_s25, [#allocation3]  }
  0x11   :  { %505 = dma.done.wait [#allocation3], 16  }
  0x12   :  { %506 = vsyncadd [#allocation3], 4294967280  ;;  %v508_v0 = vmov 0.0   ;;  %vm509_vm0 = vmmov 0   ;;  %v510_v1 = vmov 0.0|0.0   ;;  %vm47_vm1 = vcmask 64512  }
  0x13   :  { %356 = vmatprep.subr.mxu0 %v508_v0  ;;  %358 = vmatprep.mubr.msk.f32.mxu0 %vm509_vm0, %v508_v0  ;;  %v39_v2 = vld [vmem:[%s694_s1] sm:$0xff]  ;;  %v123_v5 = vld [vmem:[%s696_s3 + $0x8] sm:$0xff]  ;;  %v124_v6 = vld [vmem:[%s696_s3 + $0x10] sm:$0xff]  ;;  %vm309_vm2 = vcmask 31744  }
  0x14   :  { %431 = vmatprep.subr.bf16.mxu1 %v510_v1  ;;  %393 = vmatprep.mubr.msk.f32.mxu1 %vm509_vm0, %v508_v0  ;;  %v38_v3 = vld [vmem:[%s693_s0] sm:$0xff]  ;;  %v125_v7 = vld [vmem:[%s696_s3 + $0x18] sm:$0xff]  ;;  %v127_v11 = vld [vmem:[%s696_s3 + $0x28] sm:$0xff] }
  0x15   :  { %v122_v4 = vld [vmem:[%s696_s3] sm:$0xff]  ;;  %357 = vmatpush3.msra.mxu0 %v39_v2  ;;  %v435_v9 = vpack.c.bf16 %v125_v7, %v124_v6  ;;  %v128_v13 = vld [vmem:[%s696_s3 + $0x30] sm:$0xff]  ;;  %v129_v14 = vld [vmem:[%s696_s3 + $0x38] sm:$0xff] }
  0x16   :  { %359 = vmatmul.mubr.msk.f32.vlgmr.msra.gmra.mrb[0].mxu0 %vm47_vm1, %v38_v3  ;;  %v432_v8 = vpack.c.bf16 %v123_v5, %v122_v4  ;;  %455 = vmatprep.subr.bf16.mxu0 %v510_v1  ;;  %v126_v10 = vld [vmem:[%s696_s3 + $0x20] sm:$0xff]  ;;  %v441_v15 = vpack.c.bf16 %v129_v14, %v128_v13  ;;  %v131_v17 = vld [vmem:[%s696_s3 + $0x48] sm:$0xff]  ;;  %v132_v19 = vld [vmem:[%s696_s3 + $0x50] sm:$0xff] }
  0x17   :  { %428 = vmatprep.mubr.msk.f32.mxu0 %vm509_vm0, %v508_v0  ;;  %v438_v12 = vpack.c.bf16 %v127_v11, %v126_v10  ;;  %v130_v16 = vld [vmem:[%s696_s3 + $0x40] sm:$0xff]  ;;  %v133_v20 = vld [vmem:[%s696_s3 + $0x58] sm:$0xff]  ;;  %v135_v23 = vld [vmem:[%s696_s3 + $0x68] sm:$0xff] }
  0x18   :  { %433 = vmatpush3.bf16.msra.mxu1 %v432_v8  ;;  %v444_v18 = vpack.c.bf16 %v131_v17, %v130_v16  ;;  %v447_v21 = vpack.c.bf16 %v133_v20, %v132_v19  ;;  %v134_v22 = vld [vmem:[%s696_s3 + $0x60] sm:$0xff]  ;;  %v136_v25 = vld [vmem:[%s696_s3 + $0x70] sm:$0xff]  ;;  %v137_v26 = vld [vmem:[%s696_s3 + $0x78] sm:$0xff] }
  0x19   :  { %434 = vmatprep.subr.bf16.mxu1 %v510_v1  ;;  %v450_v24 = vpack.c.bf16 %v135_v23, %v134_v22  ;;  %v453_v27 = vpack.c.bf16 %v137_v26, %v136_v25  ;;  %v216_v28 = vld [vmem:[%s698_s5] sm:$0xff]  ;;  %v217_v29 = vld [vmem:[%s698_s5 + $0x8] sm:$0xff]  ;;  %v218_v30 = vld [vmem:[%s698_s5 + $0x10] sm:$0xff] }
  0x1a   :  { %v456_v31 = vpack.c.bf16 %v217_v29, %v216_v28  ;;  %v219_v32 = vld [vmem:[%s698_s5 + $0x18] sm:$0xff]  ;;  %v220_v34 = vld [vmem:[%s698_s5 + $0x20] sm:$0xff]  ;;  %v221_v35 = vld [vmem:[%s698_s5 + $0x28] sm:$0xff] }
  0x1b   :  { %v459_v33 = vpack.c.bf16 %v219_v32, %v218_v30  ;;  %v462_v36 = vpack.c.bf16 %v221_v35, %v220_v34  ;;  %v222_v37 = vld [vmem:[%s698_s5 + $0x30] sm:$0xff]  ;;  %v223_v38 = vld [vmem:[%s698_s5 + $0x38] sm:$0xff]  ;;  %v224_v40 = vld [vmem:[%s698_s5 + $0x40] sm:$0xff] }
  0x1c   :  { %436 = vmatpush3.bf16.msra.mxu1 %v435_v9  ;;  %457 = vmatpush3.bf16.msra.mxu0 %v456_v31  ;;  %v465_v39 = vpack.c.bf16 %v223_v38, %v222_v37  ;;  %v225_v41 = vld [vmem:[%s698_s5 + $0x48] sm:$0xff]  ;;  %v226_v43 = vld [vmem:[%s698_s5 + $0x50] sm:$0xff]  ;;  %v227_v44 = vld [vmem:[%s698_s5 + $0x58] sm:$0xff] }
  0x1d   :  { %437 = vmatprep.subr.bf16.mxu1 %v510_v1  ;;  %458 = vmatprep.subr.bf16.mxu0 %v510_v1  ;;  %v468_v42 = vpack.c.bf16 %v225_v41, %v224_v40  ;;  %v471_v45 = vpack.c.bf16 %v227_v44, %v226_v43  ;;  %v228_v46 = vld [vmem:[%s698_s5 + $0x60] sm:$0xff]  ;;  %v229_v47 = vld [vmem:[%s698_s5 + $0x68] sm:$0xff]  ;;  %v230_v54 = vld [vmem:[%s698_s5 + $0x70] sm:$0xff] }
  0x1e   :  { %v474_v48 = vpack.c.bf16 %v229_v47, %v228_v46  ;;  %v316_v49 = vld [vmem:[%s695_s2] ss:$0 sm:$0xff]  ;;  %v231_v55 = vld [vmem:[%s698_s5 + $0x78] sm:$0xff] }
  0x1f   :  { %v477_v56 = vpack.c.bf16 %v231_v55, %v230_v54  ;;  %v318_v57 = vld [vmem:[%s697_s4] ss:$0 sm:$0xff] }
  0x20   :  { %439 = vmatpush3.bf16.msra.mxu1 %v438_v12  ;;  %460 = vmatpush3.bf16.msra.mxu0 %v459_v33  ;;  %v319_v62 = vld [vmem:[#allocation2] ss:$0 sm:$0xff] }
  0x21   :  { %440 = vmatprep.subr.bf16.mxu1 %v510_v1  ;;  %461 = vmatprep.subr.bf16.mxu0 %v510_v1 }
  0x24   :  { %442 = vmatpush3.bf16.msra.mxu1 %v441_v15  ;;  %463 = vmatpush3.bf16.msra.mxu0 %v462_v36 }
  0x25   :  { %443 = vmatprep.subr.bf16.mxu1 %v510_v1  ;;  %464 = vmatprep.subr.bf16.mxu0 %v510_v1 }
  0x28   :  { %445 = vmatpush3.bf16.msra.mxu1 %v444_v18  ;;  %466 = vmatpush3.bf16.msra.mxu0 %v465_v39 }
  0x29   :  { %446 = vmatprep.subr.bf16.mxu1 %v510_v1  ;;  %467 = vmatprep.subr.bf16.mxu0 %v510_v1 }
  0x2c   :  { %448 = vmatpush3.bf16.msra.mxu1 %v447_v21  ;;  %469 = vmatpush3.bf16.msra.mxu0 %v468_v42 }
  0x2d   :  { %449 = vmatprep.subr.bf16.mxu1 %v510_v1  ;;  %470 = vmatprep.subr.bf16.mxu0 %v510_v1 }
  0x30   :  { %451 = vmatpush3.bf16.msra.mxu1 %v450_v24  ;;  %472 = vmatpush3.bf16.msra.mxu0 %v471_v45 }
  0x31   :  { %452 = vmatprep.subr.bf16.mxu1 %v510_v1  ;;  %473 = vmatprep.subr.bf16.mxu0 %v510_v1 }
  0x34   :  { %454 = vmatpush3.bf16.msra.mxu1 %v453_v27  ;;  %475 = vmatpush3.bf16.msra.mxu0 %v474_v48 }
  0x35   :  { %476 = vmatprep.subr.bf16.mxu0 %v510_v1 }
  0x38   :  { %478 = vmatpush3.bf16.msra.mxu0 %v477_v56 }
  0xe9   :  { %v117_v50 = vpop.f32.mrb[0].mxu0 }
  0xea   :  { %v118_v51 = vadd.f32 %v316_v49, %v117_v50  ;;  %v360_v52 = vpop.f32.mrb[1].mxu0 }
  0xec   :  { %v121_v53 = vmax.f32 %v118_v51, 0.0 }
  0xee   :  { %394 = vmatmul.mubr.f32.vlgmr.msra.gmra.mrb[0].mxu1 %v121_v53 }
 0x1c1   :  { %v211_v58 = vpop.f32.mrb[0].mxu1 }
 0x1c2   :  { %v212_v59 = vadd.f32 %v318_v57, %v211_v58  ;;  %v395_v60 = vpop.f32.mrb[1].mxu1 }
 0x1c4   :  { %v215_v61 = vmax.f32 %v212_v59, 0.0 }
 0x1c6   :  { %429 = vmatmul.mubr.f32.vlgmr.msra.gmra.mrb[2].mxu0 %v215_v61 }
 0x299   :  { %v305_v63 = vpop.f32.mrb[2].mxu0 }
 0x29a   :  { %v306_v0 = vadd.f32 %v319_v62, %v305_v63  ;;  %v430_v1 = vpop.f32.mrb[3].mxu0 }
 0x29c   :  { %310 = vst.msk [vmem:[%s700_s7] sm:$0xff] %vm309_vm2, %v306_v0 }
 0x29d   :  { %315 = vsyncpa [#allocation3], 1 }

</bundles_post_ra>
